<compile_context>
chip_gen: v7x
topology: tpu7x:2x2x1
jax: 0.10.0
libtpu: 0.0.40
codegen_flags: <defaults>
</compile_context>

<pallas_src>
import functools

import jax
import jax.numpy as jnp
from jax.experimental import pallas as pl
from jax.experimental.pallas import tpu as pltpu


def _supcon_row_kernel(lab_col_ref, lab_row_ref, anchor_ref, contrast_ref,
                       out_ref, *, temperature, base_temperature):
    # anchor_ref:   [TQ, D]  current tile of anchor features
    # contrast_ref: [N,  D]  full contrast features (resident across grid)
    # lab_col_ref:  [TQ, 1]  int32 labels for the anchor rows of this tile
    # lab_row_ref:  [1,  N]  int32 labels for all contrast columns
    # out_ref:      [TQ, 1]  per-anchor loss
    tq = anchor_ref.shape[0]
    n = contrast_ref.shape[0]

    # logits = (anchor @ contrast.T) / temperature   (MXU, f32 accumulation)
    logits = jax.lax.dot_general(
        anchor_ref[...], contrast_ref[...],
        dimension_numbers=(((1,), (1,)), ((), ())),
        preferred_element_type=jnp.float32,
    ) * (1.0 / temperature)                                       # [TQ, N]

    # Row-wise max over the *unmasked* logits (matches the PyTorch reference,
    # which also includes the self-similarity in the max).
    row_max = jnp.max(logits, axis=1, keepdims=True)              # [TQ, 1]
    logits = logits - row_max

    # Self-contrast (diagonal) positions for this tile's global rows.
    row_start = pl.program_id(0) * tq
    row_ids = jax.lax.broadcasted_iota(jnp.int32, (tq, n), 0) + row_start
    col_ids = jax.lax.broadcasted_iota(jnp.int32, (tq, n), 1)
    is_diag = row_ids == col_ids

    # Positive mask built in-kernel from the labels; zero on the diagonal.
    pos_mask = jnp.where(
        is_diag, 0.0,
        (lab_col_ref[...] == lab_row_ref[...]).astype(jnp.float32))  # [TQ, N]

    # Softmax denominator with the diagonal excluded: single exp over [TQ, N].
    exp_logits = jnp.where(is_diag, 0.0, jnp.exp(logits))         # [TQ, N]
    denom = jnp.sum(exp_logits, axis=1, keepdims=True)            # [TQ, 1]

    # sum_j mask * log_prob  ==  sum_j mask*logits - mask_sum * log(denom)
    pos_sum = jnp.sum(pos_mask * logits, axis=1, keepdims=True)   # [TQ, 1]
    mask_sum = jnp.sum(pos_mask, axis=1, keepdims=True)           # [TQ, 1]
    mean_log_prob_pos = (pos_sum - mask_sum * jnp.log(denom)) / mask_sum

    out_ref[...] = (-(temperature / base_temperature)
                    * mean_log_prob_pos).astype(out_ref.dtype)


def _row_tile(n):
    """Largest row tile (multiple of 8) dividing n that still gives >=2 grid
    steps; fall back to a single full block when n is small / not 8-aligned."""
    if n % 8 != 0:
        return n
    for tq in (512, 256, 128, 64, 32, 16, 8):
        if tq <= n and n % tq == 0 and n // tq >= 2:
            return tq
    return n


def supcon_loss1(features1, features2, labels,
                 temperature=0.07, base_temperature=0.07):
    """Pallas implementation of SupConLoss1.forward (contrast_mode='all')."""
    features1 = jnp.asarray(features1)
    features2 = jnp.asarray(features2)
    if not jnp.issubdtype(features1.dtype, jnp.floating):
        features1 = features1.astype(jnp.float32)
        features2 = features2.astype(jnp.float32)
    labels = jnp.asarray(labels, jnp.int32)

    b, d = features1.shape
    n = 2 * b
    tq = _row_tile(n)

    # TODO(synk): gather_from_all (multi-device all-gather) == identity here.
    # The [2B, D] concat is a tiny wrapper-side copy; the expensive [2B, 2B]
    # mask is built inside the kernel from the label vectors instead.
    feat = jnp.concatenate([features1, features2], axis=0)        # [N, D]
    labels2 = jnp.concatenate([labels, labels], axis=0)           # [N]
    lab_col = labels2.reshape(n, 1)                               # [N, 1]
    lab_row = labels2.reshape(1, n)                               # [1, N]

    kernel = functools.partial(
        _supcon_row_kernel,
        temperature=float(temperature),
        base_temperature=float(base_temperature))

    per_anchor = pl.pallas_call(
        kernel,
        out_shape=jax.ShapeDtypeStruct((n, 1), jnp.float32),
        grid=(n // tq,),
        in_specs=[
            pl.BlockSpec((tq, 1), lambda i: (i, 0)),   # anchor-row labels
            pl.BlockSpec((1, n), lambda i: (0, 0)),    # contrast labels (resident)
            pl.BlockSpec((tq, d), lambda i: (i, 0)),   # anchor feature tile
            pl.BlockSpec((n, d), lambda i: (0, 0)),    # contrast features (resident)
        ],
        out_specs=pl.BlockSpec((tq, 1), lambda i: (i, 0)),
        compiler_params=pltpu.CompilerParams(
            dimension_semantics=("parallel",)),
    )(lab_col, lab_row, feat, feat)

    # Final mean over the 2B anchors (tiny [N] reduction outside the kernel so
    # the row axis can stay "parallel" / megacore-shardable).
    return jnp.mean(per_anchor)


def _supcon_loss_ref(features1, features2, labels,
                     temperature=0.07, base_temperature=0.07):
    """Pure-JAX reference mirroring the PyTorch forward (contrast_mode='all')."""
    b = features1.shape[0]
    feat = jnp.concatenate([features1, features2], axis=0).astype(jnp.float32)
    labels2 = jnp.concatenate([labels, labels], axis=0)
    mask = (labels2[:, None] == labels2[None, :]).astype(jnp.float32)
    logits = feat @ feat.T / temperature
    logits = logits - jnp.max(logits, axis=1, keepdims=True)
    logits_mask = 1.0 - jnp.eye(2 * b, dtype=jnp.float32)
    mask = mask * logits_mask
    exp_logits = jnp.exp(logits) * logits_mask
    log_prob = logits - jnp.log(jnp.sum(exp_logits, axis=1, keepdims=True))
    mean_log_prob_pos = jnp.sum(mask * log_prob, axis=1) / jnp.sum(mask, axis=1)
    loss = -(temperature / base_temperature) * mean_log_prob_pos
    return jnp.mean(loss)


if __name__ == "__main__":
    key = jax.random.PRNGKey(0)
    k1, k2, k3 = jax.random.split(key, 3)

    B, D = 8, 32
    # L2-normalized features, as SupCon expects (two augmented views).
    f1 = jax.random.normal(k1, (B, D), dtype=jnp.float32)
    f2 = jax.random.normal(k2, (B, D), dtype=jnp.float32)
    f1 = f1 / jnp.linalg.norm(f1, axis=1, keepdims=True)
    f2 = f2 / jnp.linalg.norm(f2, axis=1, keepdims=True)
    labels = jax.random.randint(k3, (B,), 0, 4, dtype=jnp.int32)

    loss = supcon_loss1(f1, f2, labels)
    loss = jax.block_until_ready(loss)

    ref = _supcon_loss_ref(f1, f2, labels)
    assert jnp.allclose(loss, ref, rtol=1e-4, atol=1e-4), (loss, ref)

    print("KERNEL_OK")
</pallas_src>

<mosaic_0001>
module attributes {stable_mosaic.version = 11 : i64} {
  func.func @_supcon_row_kernel(%arg0: i32, %arg1: memref<8x1xi32, #tpu.memory_space<vmem>>, %arg2: memref<1x16xi32, #tpu.memory_space<vmem>>, %arg3: memref<8x32xf32, #tpu.memory_space<vmem>>, %arg4: memref<16x32xf32, #tpu.memory_space<vmem>>, %arg5: memref<8x1xf32, #tpu.memory_space<vmem>>) attributes {dimension_semantics = [#tpu.dimension_semantics<parallel>], iteration_bounds = array<i64: 2>, scalar_prefetch = 0 : i64, scratch_operands = 0 : i64, tpu.core_type = #tpu.core_type<tc>, window_params = [{transform_indices = @transform_0, window_bounds = array<i64: 8, 1>}, {pipeline_mode = #tpu.pipeline_mode<synchronous>, transform_indices = @transform_1, window_bounds = array<i64: 1, 16>}, {transform_indices = @transform_2, window_bounds = array<i64: 8, 32>}, {pipeline_mode = #tpu.pipeline_mode<synchronous>, transform_indices = @transform_3, window_bounds = array<i64: 16, 32>}, {transform_indices = @transform_4, window_bounds = array<i64: 8, 1>}]} {
    %c0 = arith.constant 0 : index
    %c0_0 = arith.constant 0 : index
    %0 = vector.load %arg3[%c0, %c0_0] : memref<8x32xf32, #tpu.memory_space<vmem>>, vector<8x32xf32>
    %c0_1 = arith.constant 0 : index
    %c0_2 = arith.constant 0 : index
    %1 = vector.load %arg4[%c0_1, %c0_2] : memref<16x32xf32, #tpu.memory_space<vmem>>, vector<16x32xf32>
    %cst = arith.constant dense<0.000000e+00> : vector<8x16xf32>
    %2 = tpu.matmul %0, %1, %cst {dimension_numbers = #tpu.dot_dimension_numbers<[1], [1], [0], [0], [0, 0, 1, 0], [], []>} : vector<8x32xf32>, vector<16x32xf32>, vector<8x16xf32> -> vector<8x16xf32>
    %cst_3 = arith.constant 14.2857141 : f32
    %3 = vector.broadcast %cst_3 : f32 to vector<8x16xf32>
    %4 = arith.mulf %2, %3 : vector<8x16xf32>
    %cst_4 = arith.constant dense<0xFF800000> : vector<8xf32>
    %5 = vector.multi_reduction <maximumf>, %4, %cst_4 [1] : vector<8x16xf32> to vector<8xf32>
    %6 = vector.shape_cast %5 : vector<8xf32> to vector<8x1xf32>
    %7 = vector.broadcast %6 : vector<8x1xf32> to vector<8x16xf32>
    %8 = arith.subf %4, %7 : vector<8x16xf32>
    %c8_i32 = arith.constant 8 : i32
    %9 = arith.muli %arg0, %c8_i32 : i32
    %10 = tpu.iota {dimensions = array<i32: 0>} : vector<8x16xi32>
    %11 = vector.broadcast %9 : i32 to vector<8x16xi32>
    %12 = arith.addi %10, %11 : vector<8x16xi32>
    %13 = tpu.iota {dimensions = array<i32: 1>} : vector<8x16xi32>
    %14 = arith.cmpi eq, %12, %13 : vector<8x16xi32>
    %c0_5 = arith.constant 0 : index
    %c0_6 = arith.constant 0 : index
    %15 = vector.load %arg1[%c0_5, %c0_6] : memref<8x1xi32, #tpu.memory_space<vmem>>, vector<8x1xi32>
    %c0_7 = arith.constant 0 : index
    %c0_8 = arith.constant 0 : index
    %16 = vector.load %arg2[%c0_7, %c0_8] : memref<1x16xi32, #tpu.memory_space<vmem>>, vector<1x16xi32>
    %17 = vector.broadcast %15 : vector<8x1xi32> to vector<8x16xi32>
    %18 = vector.broadcast %16 : vector<1x16xi32> to vector<8x16xi32>
    %19 = arith.cmpi eq, %17, %18 : vector<8x16xi32>
    %20 = arith.extui %19 : vector<8x16xi1> to vector<8x16xi32>
    %21 = arith.sitofp %20 : vector<8x16xi32> to vector<8x16xf32>
    %cst_9 = arith.constant 0.000000e+00 : f32
    %22 = vector.broadcast %cst_9 : f32 to vector<8x16xf32>
    %23 = arith.select %14, %22, %21 : vector<8x16xi1>, vector<8x16xf32>
    %24 = math.exp %8 : vector<8x16xf32>
    %cst_10 = arith.constant 0.000000e+00 : f32
    %25 = vector.broadcast %cst_10 : f32 to vector<8x16xf32>
    %26 = arith.select %14, %25, %24 : vector<8x16xi1>, vector<8x16xf32>
    %cst_11 = arith.constant dense<0.000000e+00> : vector<8xf32>
    %27 = vector.multi_reduction <add>, %26, %cst_11 [1] : vector<8x16xf32> to vector<8xf32>
    %28 = vector.shape_cast %27 : vector<8xf32> to vector<8x1xf32>
    %29 = arith.mulf %23, %8 : vector<8x16xf32>
    %cst_12 = arith.constant dense<0.000000e+00> : vector<8xf32>
    %30 = vector.multi_reduction <add>, %29, %cst_12 [1] : vector<8x16xf32> to vector<8xf32>
    %31 = vector.shape_cast %30 : vector<8xf32> to vector<8x1xf32>
    %cst_13 = arith.constant dense<0.000000e+00> : vector<8xf32>
    %32 = vector.multi_reduction <add>, %23, %cst_13 [1] : vector<8x16xf32> to vector<8xf32>
    %33 = vector.shape_cast %32 : vector<8xf32> to vector<8x1xf32>
    %34 = math.log %28 : vector<8x1xf32>
    %35 = arith.mulf %33, %34 : vector<8x1xf32>
    %36 = arith.subf %31, %35 : vector<8x1xf32>
    %37 = arith.divf %36, %33 : vector<8x1xf32>
    %cst_14 = arith.constant -1.000000e+00 : f32
    %38 = vector.broadcast %cst_14 : f32 to vector<8x1xf32>
    %39 = arith.mulf %38, %37 : vector<8x1xf32>
    %c0_15 = arith.constant 0 : index
    %c0_16 = arith.constant 0 : index
    %40 = vector.load %arg5[%c0_15, %c0_16] : memref<8x1xf32, #tpu.memory_space<vmem>>, vector<8x1xf32>
    tpu.vector_store %arg5[%c0_15, %c0_16], %39 {strides = array<i32>} : memref<8x1xf32, #tpu.memory_space<vmem>>, vector<8x1xf32>,
    return
  }
  func.func @transform_0(%arg0: i32) -> (i32, i32) {
    %c0_i32 = arith.constant 0 : i32
    %c0_i32_0 = arith.constant 0 : i32
    return %arg0, %c0_i32 : i32, i32
  }
  func.func @transform_1(%arg0: i32) -> (i32, i32) {
    %c0_i32 = arith.constant 0 : i32
    %c0_i32_0 = arith.constant 0 : i32
    %c0_i32_1 = arith.constant 0 : i32
    return %c0_i32, %c0_i32_0 : i32, i32
  }
  func.func @transform_2(%arg0: i32) -> (i32, i32) {
    %c0_i32 = arith.constant 0 : i32
    %c0_i32_0 = arith.constant 0 : i32
    return %arg0, %c0_i32 : i32, i32
  }
  func.func @transform_3(%arg0: i32) -> (i32, i32) {
    %c0_i32 = arith.constant 0 : i32
    %c0_i32_0 = arith.constant 0 : i32
    %c0_i32_1 = arith.constant 0 : i32
    return %c0_i32, %c0_i32_0 : i32, i32
  }
  func.func @transform_4(%arg0: i32) -> (i32, i32) {
    %c0_i32 = arith.constant 0 : i32
    %c0_i32_0 = arith.constant 0 : i32
    return %arg0, %c0_i32 : i32, i32
  }
}

</mosaic_0001>

<bundles_post_ra>
// kernel: tpu_custom_call.1
= control target key start
LH: loop header
LB: loop body
LE: loop exit
PB: predicated region body
PF: predicated region fallthrough
CT: control target
= control target key end

     0   :  { %9 = vsyncpa [#allocation3], 0  ;;  %s570_s15 = smov 0   ;;  %s642_s0 = inlined_call_operand.vmem [shape: s32[16,1], index: 0, kind: input, shape index: {}]   ;;  %s643_s1 = inlined_call_operand.vmem [shape: s32[1,16], index: 1, kind: input, shape index: {}]   ;;  %s644_s2 = inlined_call_operand.vmem [shape: f32[16,32], index: 2, kind: input, shape index: {}]   ;;  %s645_s3 = inlined_call_operand.hbm [shape: f32[16,32], index: 3, kind: input, shape index: {}]   ;;  %s646_s4 = inlined_call_operand.vmem [shape: f32[16,1], index: 4, kind: output, shape index: {}]  }
   0x1 LB: > { %s576_s16 = sadd.s32 4294967295, %s536_s15   ;;  %p436_p0 = scmp.ge.s32.totalorder %s536_s15, 1  ;;  %s536_s15 = sphi %s570_s15, %s15_s15  }
   0x2   : > { %p140_p1 = scmp.lt.s32.totalorder %s536_s15, 3  ;;  %s538_s17 = smov [#allocation2]  }
   0x3   : > { %s155_s18 = sshll.u32 %s538_s17, 4  ;;  %p647_p3 = scmp.eq.s32.totalorder %s576_s16, 0  ;;  %s156_s18 = int_to_ptr.vmem [resolvable:$true] %s155_s18 }
   0x4   : > { %p580_p2 = pnand %p436_p0, %p140_p1  ;;  %s498_s23 = scalar_lea.hbm %s645_s3, 256 }
   0x5   : > { %p499_p6 = scmp.ne.s32.totalorder %s645_s3, %s498_s23  ;;  %p505_p10 = scmp.lt.u32.totalorder %s498_s23, %s645_s3 }
   0x6   : > { %s649_s19 = scalar_select %p580_p2, 1, 0 }
   0x7   : > { %p470_p4 = pneg %p580_p2 }
   0x9   : > { %p589_p5 = pnand %p647_p3, %p470_p4 }
   0xb   : > { %p500_p7 = pneg %p589_p5 }
   0xd   : > { %p501_p8 = pnand %p500_p7, %p499_p6 }
   0xf   : > { %p502_p9 = pneg %p501_p8 }
  0x11   : > { %p507_p11 = pnand %p505_p10, %p502_p9 }
  0x13   : > { %510 = shalt.err (!%p507_p11)
}
  0x14   : > { %s511_s28 = scalar_lea.vmem %s156_s18, 256  ;;  %p519_p1 = scmp.lt.s32.totalorder %s156_s18, %s156_s18 }
  0x15   : > { %p512_p12 = scmp.ne.s32.totalorder %s156_s18, %s511_s28  ;;  %p520_p4 = scmp.lt.s32.totalorder %s511_s28, %s511_s28 }
  0x17   : > { %p514_p13 = pnand %p512_p12, %p500_p7  ;;  %p521_p3 = por %p520_p4, %p519_p1 }
  0x19   : > { %p515_p0 = pneg %p514_p13 }
  0x1b   : > { %p522_p2 = pnand %p521_p3, %p515_p0 }
  0x1d   : > { %525 = shalt.err (!%p522_p2)
}
  0x1e   : > { %s539_s29 = smov 128   ;;  %s540_s30 = smov 8  }
  0x1f   : > { %473 = dma.hbm_to_vmem [thread:$0]  (!%p589_p5), %s645_s3, 256, %s156_s18, [#allocation3], %s539_s29, %s539_s29, %s540_s30  }
  0x20   : > { %p651_p6 = scmp.ne.s32.totalorder %s649_s19, 0 }
  0x21   : > { %p652_p8 = scmp.eq.s32.totalorder (!%p651_p6), %s576_s16, 0 }
  0x22   : > { %185 = sbr.rel (%p651_p6) target bundleno = 591 (0x24f), region = 36 }
  0x29   : > { %531 = dma.done.wait (%p652_p8), [#allocation3], 256   ;;  %p653_p7 = pmov %p652_p8 }
  0x2a   : > { %v541_v0 = vmov 0.0|0.0   ;;  %vm542_vm0 = vmmov 0   ;;  %v543_v1 = vmov 0.0   ;;  %p213_p2 = scmp.lt.s32.totalorder %s576_s16, 1  ;;  %vm228_vm1 = vcmask 261120   ;;  %v226_v2 = vld [vmem:[#allocation2] sm:$0xff] }
  0x2b   : > { %533 = vsyncadd (%p653_p7), [#allocation3], 4294967040  ;;  %462 = vmatprep.subr.bf16.mxu0 %v541_v0  ;;  %459 = vmatprep.mubr.msk.f32.mxu0 %vm542_vm0, %v543_v1  ;;  %v227_v3 = vld [vmem:[#allocation2 + $0x8] sm:$0xff]  ;;  %v544_v6 = vmov 0   ;;  %vm309_vm3 = vcmask 130048   ;;  %v315_v15 = vlaneseq  ;;  %s447_s17 = sshll.u32 %s576_s16, 3 }
  0x2c   : > { %s214_s7 = scalar_select %p213_p2, %s576_s16, 1  ;;  %vm464_vm2 = vmpackc.low %vm228_vm1, %vm228_vm1  ;;  %v463_v4 = vpack.c.bf16 %v227_v3, %v226_v2  ;;  %491 = vset.pattern.permute.xlu0 %v544_v6  ;;  %v317_v17 = vstv %s447_s17  ;;  %v448_v18 = vld [vmem:[%s643_s1] ss:$0 sm:$0xff]  ;;  %vm355_vm6 = vcmask 7168  }
  0x2d   : > { %v316_v16 = vshrl.u32 %v315_v15, 7  ;;  %v320_v21 = vand.u32 127, %v315_v15 }
  0x2e   : > { %s617_s8 = sshll.u32 %s214_s7, 3  ;;  %465 = vmatpush3.bf16.xpose.msk.msra.mxu0 %vm464_vm2, %v463_v4 }
  0x2f   : > { %s220_s11 = scalar_lea.vmem %s644_s2, %s617_s8  ;;  %s216_s14 = scalar_lea.vmem %s642_s0, %s617_s8  ;;  %v318_v20 = vadd.s32 %v317_v17, %v316_v16 }
  0x30   : > { %v225_v5 = vld [vmem:[%s220_s11] sm:$0xff]  ;;  %s224_s21 = scalar_lea.vmem %s646_s4, %s617_s8 }
  0x31   : > { %v322_v11 = vld [vmem:[%s216_s14] sm:$0xff]  ;;  %vm321_vm5 = vcmp.eq.s32.totalorder %v318_v20, %v320_v21 }
  0x35   : > { %460 = vmatmul.mubr.msk.f32.vlgmr.msra.gmra.mrb[0].mxu0 %vm228_vm1, %v225_v5 }
 0x108   : > { %v304_v7 = vpop.f32.mrb[0].mxu0 }
 0x109   : > { %v308_v8 = vmul.f32 14.285714, %v304_v7  ;;  %v461_v9 = vpop.f32.mrb[1].mxu0 }
 0x10b   : > { %v310_v10 = vsel %vm309_vm3, %v308_v8, -inf }
 0x10c   : > { %311 = vmax.xlane.f32.xlu0 %v310_v10 }
 0x122   : > { %325 = vperm.xlu0 %491, %v322_v11  }
 0x199   : > { %v312_v12 = vpop.xlane.xlu0 %311 }
 0x19a   : > { %v313_v13 = vsub.f32 %v308_v8, %v312_v12 }
 0x19c   : > { %v335_v14 = vmul.f32 1.442695, %v313_v13 }
 0x19e   : > { %492 = vpow2.f32 %v335_v14 }
 0x1a1   : > { %v326_v19 = vpop.permute.xlu0 %325 }
 0x1a2   : > { %vm331_vm4 = vcmp.eq.s32.totalorder %v326_v19, %v448_v18 }
 0x1a3   : > { %v449_v23 = vsel %vm331_vm4, 1.0, %v543_v1 }
 0x1a4   : > { %v334_v26 = vsel %vm321_vm5, 0.0, %v449_v23 }
 0x1a5   : > { %v345_v27 = vsel %vm309_vm3, %v334_v26, 0.0  ;;  %v341_v28 = vmul.f32 %v334_v26, %v313_v13 }
 0x1a7   : > { %v342_v29 = vsel %vm309_vm3, %v341_v28, 0.0 }
 0x1a8   : > { %v493_v22 = vpop.eup %492 }
 0x1a9   : > { %v337_v24 = vsel %vm321_vm5, 0.0, %v493_v22 }
 0x1aa   : > { %v338_v25 = vsel %vm309_vm3, %v337_v24, 0.0 }
 0x1ab   : > { %339 = vadd.xlane.f32.xlu1 %v338_v25 }
 0x1af   : > { %346 = vadd.xlane.f32.xlu1 %v345_v27 }
 0x1b3   : > { %343 = vadd.xlane.f32.xlu1 %v342_v29 }
 0x238   : > { %v340_v30 = vpop.xlane.xlu1 %339 }
 0x239   : > { %494 = vlog2.f32 %v340_v30 }
 0x23c   : > { %v347_v31 = vpop.xlane.xlu1 %346 }
 0x23d   : > { %496 = vrcp.f32 %v347_v31 }
 0x240   : > { %v344_v36 = vpop.xlane.xlu1 %343 }
 0x243   : > { %v495_v32 = vpop.eup %494 }
 0x244   : > { %v349_v33 = vmul.f32 0.6931472, %v495_v32 }
 0x246   : > { %v350_v34 = vmul.f32 %v349_v33, %v347_v31 }
 0x247   : > { %v497_v35 = vpop.eup %496 }
 0x248   : > { %v351_v37 = vsub.f32 %v344_v36, %v350_v34 }
 0x24a   : > { %v353_v38 = vmul.f32 %v497_v35, %v351_v37 }
 0x24c   : > { %v354_v39 = vmul.f32 -1.0, %v353_v38 }
 0x24e   : > { %356 = vst.msk [vmem:[%s224_s21] sm:$0xff] %vm355_vm6, %v354_v39 }
 0x24f PF: > { %s15_s15 = sadd.s32 1, %s536_s15  }
 0x250   : > { %p12_p3 = scmp.ge.s32.totalorder %s15_s15, 4  }
 0x252   :  { %14 = sbr.rel (!%p12_p3) target bundleno = 1 (0x1), region = 74 }
 0x259   :  { %376 = vsyncpa [#allocation3], 1 }
 0x25a   :  { %378 = vsyncpa [#allocation3 + $0x1], 1 }

</bundles_post_ra>
